<compile_context>
chip_gen: v7x
topology: tpu7x:2x2x1
jax: 0.10.0
libtpu: 0.0.40
codegen_flags: <defaults>
</compile_context>

<pallas_src>
import jax
import jax.numpy as jnp
from jax.experimental import pallas as pl
from jax.experimental.pallas import tpu as pltpu


def _fusion_kernel(txt_ref, img_ref, w_ref, b_ref, out_ref):
    # attended = image_features @ (Wv @ Wo) + (bv @ Wo + bo)   -- single MXU pass.
    attended = (jnp.dot(img_ref[...], w_ref[...],
                        preferred_element_type=jnp.float32)
                + b_ref[...])                                  # [tb, E]
    # Dropout is the identity in eval/inference mode.
    # concat([attended, text_features], dim=1) -> one lane-dense [tb, 2E] store.
    out_ref[...] = jnp.concatenate(
        [attended, txt_ref[...].astype(jnp.float32)], axis=-1
    ).astype(out_ref.dtype)


def init_params(key, *, E, scale=0.02):
    ks = jax.random.split(key, 8)

    def nrm(k, shape):
        return scale * jax.random.normal(k, shape, dtype=jnp.float32)

    # nn.MultiheadAttention in_proj (Q/K/V) + out_proj, pre-transposed so the
    # forward computes x @ W (+ b).  Q/K are only consumed by the pure-JAX
    # reference: with a single key/value token they cannot affect the output,
    # so they are intentionally never fed to the kernel.
    return {
        "wq": nrm(ks[0], (E, E)), "bq": nrm(ks[1], (1, E)),
        "wk": nrm(ks[2], (E, E)), "bk": nrm(ks[3], (1, E)),
        "wv": nrm(ks[4], (E, E)), "bv": nrm(ks[5], (1, E)),
        "wo": nrm(ks[6], (E, E)), "bo": nrm(ks[7], (1, E)),
    }


def fuse_attention_params(params):
    """Precompute the fused V->O linear map ONCE (hoisted out of the per-call
    forward path as requested by the perf review)."""
    return {
        "w_fused": params["wv"] @ params["wo"],                 # [E, E]
        "b_fused": params["bv"] @ params["wo"] + params["bo"],  # [1, E]
    }


def _pick_block_b(B, block_b=None):
    """Batch-tile selection:
      * large tile (amortize ~0.35 us / ~600-cycle per-grid-step overhead),
      * multiple of 8 (f32 sublane tile),
      * capped at 1024 rows (well inside v7x's 64 MiB VMEM with double-buffered
        inputs + output + resident weight),
      * >= 2 grid steps when B >= 16 so dimension_semantics=("parallel",) can
        actually shard across both TensorCores on v7x,
      * divides B when possible (avoids a ragged, padded final tile).
    """
    target = B if block_b is None else min(block_b, B)
    target = min(target, 1024)
    if B >= 16:
        target = min(target, max(8, (B // 2) // 8 * 8))
    target = max(8, (target // 8) * 8)
    tb = target
    while tb > 8 and B % tb != 0:
        tb -= 8
    return tb if B % tb == 0 else target  # fall back to ragged last tile (cdiv)


def fusion_forward(text_features, image_features, fused_params, *, block_b=None):
    B, E = text_features.shape
    w_fused = fused_params["w_fused"]
    b_fused = fused_params["b_fused"]

    tb = _pick_block_b(B, block_b)
    grid = (pl.cdiv(B, tb),)

    cost = pl.CostEstimate(
        flops=2 * B * E * E,
        transcendentals=0,
        bytes_accessed=4 * (2 * B * E + E * E + E + 2 * B * E),
    )

    return pl.pallas_call(
        _fusion_kernel,
        out_shape=jax.ShapeDtypeStruct((B, 2 * E), jnp.float32),
        grid=grid,
        in_specs=[
            pl.BlockSpec((tb, E), lambda i: (i, 0)),           # text_features
            pl.BlockSpec((tb, E), lambda i: (i, 0)),           # image_features
            # Constant-index resident blocks: single-buffer (no point
            # double-buffering a block whose index never changes).
            pl.BlockSpec((E, E), lambda i: (0, 0),
                         pipeline_mode=pl.Buffered(1)),        # fused weight
            pl.BlockSpec((1, E), lambda i: (0, 0),
                         pipeline_mode=pl.Buffered(1)),        # fused bias
        ],
        out_specs=pl.BlockSpec((tb, 2 * E), lambda i: (i, 0)),
        compiler_params=pltpu.CompilerParams(
            dimension_semantics=("parallel",)),
        cost_estimate=cost,
    )(text_features, image_features, w_fused, b_fused)


def fusion_reference(text_features, image_features, params, *, heads=8):
    """Pure-JAX reference implementing the FULL multi-head attention path
    (including Q/K projections and the explicit single-key softmax) so the
    kernel's exact simplification is verified, not assumed."""
    B, E = text_features.shape
    hd = E // heads

    q = text_features @ params["wq"] + params["bq"]
    k = image_features @ params["wk"] + params["bk"]
    v = image_features @ params["wv"] + params["bv"]

    qh = q.reshape(B, heads, hd)
    kh = k.reshape(B, heads, hd)
    vh = v.reshape(B, heads, hd)

    scores = jnp.einsum("bhd,bhd->bh", qh, kh) / jnp.sqrt(hd)   # [B, H]
    w = jax.nn.softmax(scores[..., None], axis=-1)              # length-1 key axis -> 1.0
    attn = (w * vh).reshape(B, E)

    attended = attn @ params["wo"] + params["bo"]
    # TODO(synk): dropout / attention-weights output omitted (eval mode; weights unused).
    return jnp.concatenate([attended, text_features], axis=-1)  # [B, 2E]


if __name__ == "__main__":
    # B=32 -> tile picker chooses tb=16, grid=(2,): >=2 parallel steps (v7x),
    # tiles divide B, and the [tb, 2E] = [16, 128] output is lane-dense.
    # E=64 so 2E = 128 lanes; heads=8 -> head_dim=8.
    B, E, HEADS = 32, 64, 8

    key = jax.random.PRNGKey(0)
    k_txt, k_img, k_par = jax.random.split(key, 3)

    text_features = jax.random.normal(k_txt, (B, E), dtype=jnp.float32)
    image_features = jax.random.normal(k_img, (B, E), dtype=jnp.float32)
    params = init_params(k_par, E=E)
    fused = fuse_attention_params(params)   # hoisted: done once, not per call

    out = fusion_forward(text_features, image_features, fused)
    out = jax.block_until_ready(out)

    ref = fusion_reference(text_features, image_features, params, heads=HEADS)
    assert out.shape == (B, 2 * E)
    assert jnp.allclose(out, ref, atol=1e-4, rtol=1e-4), "mismatch vs reference"

    print("KERNEL_OK")
</pallas_src>

<mosaic_0001>
module attributes {stable_mosaic.version = 11 : i64} {
  func.func @_fusion_kernel(%arg0: i32, %arg1: memref<16x64xf32, #tpu.memory_space<vmem>>, %arg2: memref<16x64xf32, #tpu.memory_space<vmem>>, %arg3: memref<64x64xf32, #tpu.memory_space<vmem>>, %arg4: memref<1x64xf32, #tpu.memory_space<vmem>>, %arg5: memref<16x128xf32, #tpu.memory_space<vmem>>) attributes {dimension_semantics = [#tpu.dimension_semantics<parallel>], iteration_bounds = array<i64: 2>, scalar_prefetch = 0 : i64, scratch_operands = 0 : i64, tpu.core_type = #tpu.core_type<tc>, window_params = [{transform_indices = @transform_0, window_bounds = array<i64: 16, 64>}, {transform_indices = @transform_1, window_bounds = array<i64: 16, 64>}, {pipeline_mode = #tpu.pipeline_mode<synchronous>, transform_indices = @transform_2, window_bounds = array<i64: 64, 64>}, {pipeline_mode = #tpu.pipeline_mode<synchronous>, transform_indices = @transform_3, window_bounds = array<i64: 1, 64>}, {transform_indices = @transform_4, window_bounds = array<i64: 16, 128>}]} {
    %c0 = arith.constant 0 : index
    %c0_0 = arith.constant 0 : index
    %0 = vector.load %arg2[%c0, %c0_0] : memref<16x64xf32, #tpu.memory_space<vmem>>, vector<16x64xf32>
    %c0_1 = arith.constant 0 : index
    %c0_2 = arith.constant 0 : index
    %1 = vector.load %arg3[%c0_1, %c0_2] : memref<64x64xf32, #tpu.memory_space<vmem>>, vector<64x64xf32>
    %cst = arith.constant dense<0.000000e+00> : vector<16x64xf32>
    %2 = tpu.matmul %0, %1, %cst {dimension_numbers = #tpu.dot_dimension_numbers<[1], [0], [0], [1], [0, 0, 1, 1], [], []>} : vector<16x64xf32>, vector<64x64xf32>, vector<16x64xf32> -> vector<16x64xf32>
    %c0_3 = arith.constant 0 : index
    %c0_4 = arith.constant 0 : index
    %3 = vector.load %arg4[%c0_3, %c0_4] : memref<1x64xf32, #tpu.memory_space<vmem>>, vector<1x64xf32>
    %4 = vector.broadcast %3 : vector<1x64xf32> to vector<16x64xf32>
    %5 = arith.addf %2, %4 : vector<16x64xf32>
    %c0_5 = arith.constant 0 : index
    %c0_6 = arith.constant 0 : index
    %6 = vector.load %arg1[%c0_5, %c0_6] : memref<16x64xf32, #tpu.memory_space<vmem>>, vector<16x64xf32>
    %7 = tpu.concatenate %5, %6 in 1 : vector<16x64xf32>, vector<16x64xf32> -> vector<16x128xf32>
    %c0_7 = arith.constant 0 : index
    %c0_8 = arith.constant 0 : index
    %8 = vector.load %arg5[%c0_7, %c0_8] : memref<16x128xf32, #tpu.memory_space<vmem>>, vector<16x128xf32>
    tpu.vector_store %arg5[%c0_7, %c0_8], %7 {strides = array<i32>} : memref<16x128xf32, #tpu.memory_space<vmem>>, vector<16x128xf32>,
    return
  }
  func.func @transform_0(%arg0: i32) -> (i32, i32) {
    %c0_i32 = arith.constant 0 : i32
    %c0_i32_0 = arith.constant 0 : i32
    return %arg0, %c0_i32 : i32, i32
  }
  func.func @transform_1(%arg0: i32) -> (i32, i32) {
    %c0_i32 = arith.constant 0 : i32
    %c0_i32_0 = arith.constant 0 : i32
    return %arg0, %c0_i32 : i32, i32
  }
  func.func @transform_2(%arg0: i32) -> (i32, i32) {
    %c0_i32 = arith.constant 0 : i32
    %c0_i32_0 = arith.constant 0 : i32
    %c0_i32_1 = arith.constant 0 : i32
    return %c0_i32, %c0_i32_0 : i32, i32
  }
  func.func @transform_3(%arg0: i32) -> (i32, i32) {
    %c0_i32 = arith.constant 0 : i32
    %c0_i32_0 = arith.constant 0 : i32
    %c0_i32_1 = arith.constant 0 : i32
    return %c0_i32, %c0_i32_0 : i32, i32
  }
  func.func @transform_4(%arg0: i32) -> (i32, i32) {
    %c0_i32 = arith.constant 0 : i32
    %c0_i32_0 = arith.constant 0 : i32
    return %arg0, %c0_i32 : i32, i32
  }
}

</mosaic_0001>

<bundles_post_ra>
// kernel: tpu_custom_call.1
= control target key start
LH: loop header
LB: loop body
LE: loop exit
PB: predicated region body
PF: predicated region fallthrough
CT: control target
= control target key end

     0   :  { %s1110_s0 = inlined_call_operand.hbm [shape: f32[32,64], index: 0, kind: input, shape index: {}]   ;;  %s1111_s1 = inlined_call_operand.hbm [shape: f32[32,64], index: 1, kind: input, shape index: {}]   ;;  %s1112_s2 = inlined_call_operand.hbm [shape: f32[64,64], index: 2, kind: input, shape index: {}]   ;;  %s1113_s3 = inlined_call_operand.vmem [shape: f32[1,64], index: 3, kind: input, shape index: {}]   ;;  %s1114_s4 = inlined_call_operand.hbm [shape: f32[32,128], index: 4, kind: output, shape index: {}]  }
   0x1   :  { %1122 = sst [smem:[#allocation14_spill]] %s1110_s0 }
   0x2   :  { %1123 = sst [smem:[#allocation15_spill]] %s1112_s2 }
   0x3   :  { %9 = vsyncpa [#allocation3], 0 }
   0x4   :  { %11 = vsyncpa [#allocation3 + $0x1], 0 }
   0x5   :  { %12 = vsyncpa [#allocation6], 0 }
   0x6   :  { %14 = vsyncpa [#allocation6 + $0x1], 0 }
   0x7   :  { %15 = vsyncpa [#allocation4], 0 }
   0x8   :  { %17 = vsyncpa [#allocation4 + $0x1], 0  ;;  %s841_s15 = smov 0   ;;  %s843_s16 = smov 0  }
   0x9   :  { %s845_s17 = smov 0   ;;  %s847_s18 = smov 0  }
   0xa LB: > { %s862_s19 = sadd.s32 4294967295, %s805_s18   ;;  %s505_s20 = sadd.s32 4294967294, %s805_s18   ;;  %s805_s18 = sphi %s847_s18, %s1146_s18   ;;  %s801_s17 = sphi %s845_s17, %s1145_s17   ;;  %s797_s16 = sphi %s843_s16, %s1144_s16   ;;  %s793_s15 = sphi %s841_s15, %s1143_s15  }
   0xb   : > { %p43_p0 = scmp.ne.s32.totalorder %s797_s16, %s793_s15  ;;  %p1115_p1 = scmp.eq.s32.totalorder %s862_s19, 0 }
   0xc   : > { %p141_p3 = scmp.eq.s32.totalorder %s505_s20, 1  ;;  %p506_p5 = scmp.ge.s32.totalorder %s805_s18, 1 }
   0xd   : > { %p871_p4 = por %p1115_p1, %p43_p0  ;;  %p148_p7 = scmp.lt.s32.totalorder %s805_s18, 3 }
   0xe   : > { %p876_p6 = por %p141_p3, %p43_p0  ;;  %s807_s24 = smov [#allocation7]  }
   0xf   : > { %s1124_s21 = scalar_select %p871_p4, 1, 0 }
  0x10   : > { %s1125_s22 = scalar_select %p876_p6, 1, 0 }
  0x11   : > { %p881_p8 = pnand %p506_p5, %p148_p7  ;;  %s160_s25 = sshll.u32 %s807_s24, 4  ;;  %s885_s25 = int_to_ptr.vmem [resolvable:$true] %s160_s25 }
  0x12   : > { %s897_s27 = sadd.s32 1, %s805_s18   ;;  %s30_s28 = sadd.s32 1, %s801_s17 }
  0x13   : > { %s1126_s23 = scalar_select %p881_p8, 1, 0 }
  0x14   : > { %p586_p9 = pneg %p881_p8  ;;  %s27_s29 = ssub.s32 %s805_s18, %s897_s27 }
  0x15   : > { %s1128_s2 = sld [smem:[#allocation15_spill]] }
  0x16   : > { %p892_p11 = pnand %p586_p9, %p1115_p1 }
  0x18   : > { %p645_p13 = pneg %p892_p11 }
  0x1b   : > { %s643_s6 = scalar_lea.hbm %s1128_s2, 1024 }
  0x1c   : > { %p644_p12 = scmp.ne.s32.totalorder %s1128_s2, %s643_s6  ;;  %p650_p5 = scmp.lt.u32.totalorder %s643_s6, %s1128_s2 }
  0x1e   : > { %p646_p0 = pnand %p645_p13, %p644_p12 }
  0x20   : > { %p647_p3 = pneg %p646_p0 }
  0x22   : > { %p652_p7 = pnand %p650_p5, %p647_p3 }
  0x24   : > { %655 = shalt.err (!%p652_p7)
}
  0x25   : > { %s656_s11 = scalar_lea.vmem %s885_s25, 1024  ;;  %p664_p2 = scmp.lt.s32.totalorder %s885_s25, %s885_s25 }
  0x26   : > { %p657_p9 = scmp.ne.s32.totalorder %s885_s25, %s656_s11  ;;  %p665_p6 = scmp.lt.s32.totalorder %s656_s11, %s656_s11 }
  0x28   : > { %p659_p10 = pnand %p657_p9, %p645_p13  ;;  %p666_p4 = por %p665_p6, %p664_p2 }
  0x2a   : > { %p660_p1 = pneg %p659_p10 }
  0x2c   : > { %p667_p8 = pnand %p666_p4, %p660_p1 }
  0x2e   : > { %670 = shalt.err (!%p667_p8)
}
  0x2f   : > { %s1118_s12 = smov 128   ;;  %s1120_s13 = smov 8  }
  0x30   : > { %589 = dma.hbm_to_vmem [thread:$0]  (!%p892_p11), %s1128_s2, 1024, %s885_s25, [#allocation6], %s1118_s12, %s1118_s12, %s1120_s13  }
  0x31   : > { %p28_p1 = scmp.eq.s32.totalorder %s27_s29, 0  ;;  %p37_p2 = scmp.ne.s32.totalorder %s801_s17, %s797_s16 }
  0x32   : > { %p38_p4 = scmp.eq.s32.totalorder %s805_s18, 0  ;;  %p602_p6 = scmp.lt.s32.totalorder %s805_s18, 2 }
  0x33   : > { %s931_s24 = scalar_select %p28_p1, %s801_s17, %s30_s28  }
  0x34   : > { %p39_p8 = por %p38_p4, %p37_p2  ;;  %p1130_p10 = scmp.eq.s32.totalorder %s862_s19, 1 }
  0x35   : > { %1129 = sst [smem:[#allocation13_spill]] %s931_s24  ;;  %s177_s26 = sand.u32 1, %s801_s17  }
  0x36   : > { %p935_p12 = por %p1130_p10, %p37_p2  ;;  %s528_s5 = sshll.u32 %s805_s18, 8 }
  0x37   : > { %s941_s6 = sshll.u32 %s177_s26, 4  ;;  %s1132_s0 = sld [smem:[#allocation14_spill]] }
  0x38   : > { %s181_s28 = scalar_lea.vmem [#allocation2], %s941_s6  ;;  %p949_p11 = pnand %p602_p6, %p39_p8 }
  0x39   : > { %s188_s29 = sshll.u32 %s181_s28, 4  ;;  %s958_s14 = scalar_lea.hbm %s1111_s1, %s528_s5  ;;  %s953_s29 = int_to_ptr.vmem [resolvable:$true] %s188_s29 }
  0x3a   : > { %s960_s20 = scalar_lea.sflag [#allocation3], %s177_s26  ;;  %p673_p0 = pneg %p949_p11 }
  0x3d   : > { %s946_s25 = scalar_lea.hbm %s1132_s0, %s528_s5  ;;  %s676_s12 = scalar_lea.hbm %s1132_s0, 512 }
  0x3e   : > { %s671_s7 = scalar_lea.hbm %s946_s25, 256  ;;  %p677_p7 = scmp.lt.u32.totalorder %s946_s25, %s1132_s0 }
  0x3f   : > { %p672_p13 = scmp.ne.s32.totalorder %s946_s25, %s671_s7  ;;  %p678_p9 = scmp.lt.u32.totalorder %s676_s12, %s671_s7 }
  0x40   : > { %p680_p2 = scmp.lt.u32.totalorder %s671_s7, %s946_s25 }
  0x41   : > { %p674_p3 = pnand %p673_p0, %p672_p13  ;;  %p679_p1 = por %p678_p9, %p677_p7 }
  0x43   : > { %p675_p5 = pneg %p674_p3  ;;  %p681_p4 = por %p680_p2, %p679_p1 }
  0x45   : > { %p682_p6 = pnand %p681_p4, %p675_p5 }
  0x47   : > { %685 = shalt.err (!%p682_p6)
}
  0x48   : > { %s686_s26 = scalar_lea.vmem %s953_s29, 256  ;;  %s810_s5 = smov [#allocation2]  }
  0x49   : > { %p687_p8 = scmp.ne.s32.totalorder %s953_s29, %s686_s26  ;;  %s691_s10 = sshll.u32 %s810_s5, 4  ;;  %s692_s10 = int_to_ptr.vmem [resolvable:$false] %s691_s10 }
  0x4a   : > { %s693_s2 = scalar_lea.vmem %s692_s10, 512  ;;  %p694_p3 = scmp.lt.s32.totalorder %s953_s29, %s692_s10 }
  0x4b   : > { %p689_p10 = pnand %p687_p8, %p673_p0  ;;  %p695_p7 = scmp.lt.s32.totalorder %s693_s2, %s686_s26 }
  0x4d   : > { %p690_p13 = pneg %p689_p10  ;;  %p696_p9 = por %p695_p7, %p694_p3 }
  0x4f   : > { %p697_p1 = pnand %p696_p9, %p690_p13 }
  0x51   : > { %700 = shalt.err (!%p697_p1)
}
  0x52   : > { %s1134_s12 = smov 8   ;;  %s1135_s13 = smov 128  }
  0x53   : > { %593 = dma.hbm_to_vmem [thread:$0]  (!%p949_p11), %s946_s25, 256, %s953_s29, %s960_s20, %s1135_s13, %s1135_s13, %s1134_s12  }
  0x54   : > { %s202_s11 = scalar_lea.vmem [#allocation5], %s941_s6  ;;  %s198_s8 = sand.u32 1, %s805_s18  }
  0x55   : > { %s209_s7 = sshll.u32 %s202_s11, 4  ;;  %s995_s28 = scalar_lea.sflag [#allocation6], %s198_s8  ;;  %s993_s7 = int_to_ptr.vmem [resolvable:$true] %s209_s7 }
  0x56   : > { %s701_s26 = scalar_lea.hbm %s958_s14, 256  ;;  %s706_s2 = scalar_lea.hbm %s1111_s1, 512 }
  0x57   : > { %p702_p5 = scmp.ne.s32.totalorder %s958_s14, %s701_s26  ;;  %p707_p6 = scmp.lt.u32.totalorder %s958_s14, %s1111_s1 }
  0x58   : > { %p708_p8 = scmp.lt.u32.totalorder %s706_s2, %s701_s26  ;;  %p710_p13 = scmp.lt.u32.totalorder %s701_s26, %s958_s14 }
  0x59   : > { %p704_p2 = pnand %p702_p5, %p673_p0 }
  0x5a   : > { %p709_p10 = por %p708_p8, %p707_p6 }
  0x5b   : > { %p705_p4 = pneg %p704_p2 }
  0x5c   : > { %p711_p3 = por %p710_p13, %p709_p10 }
  0x5e   : > { %p712_p7 = pnand %p711_p3, %p705_p4 }
  0x60   : > { %715 = shalt.err (!%p712_p7)
}
  0x61   : > { %s716_s6 = scalar_lea.vmem %s993_s7, 256  ;;  %s811_s25 = smov [#allocation5]  }
  0x62   : > { %p717_p9 = scmp.ne.s32.totalorder %s993_s7, %s716_s6  ;;  %s721_s29 = sshll.u32 %s811_s25, 4  ;;  %s722_s29 = int_to_ptr.vmem [resolvable:$false] %s721_s29 }
  0x63   : > { %s723_s0 = scalar_lea.vmem %s722_s29, 512  ;;  %p724_p2 = scmp.lt.s32.totalorder %s993_s7, %s722_s29 }
  0x64   : > { %p719_p1 = pnand %p717_p9, %p673_p0  ;;  %p725_p6 = scmp.lt.s32.totalorder %s723_s0, %s716_s6 }
  0x66   : > { %p720_p5 = pneg %p719_p1  ;;  %p726_p8 = por %p725_p6, %p724_p2 }
  0x68   : > { %p727_p10 = pnand %p726_p8, %p720_p5 }
  0x6a   : > { %730 = shalt.err (!%p727_p10)
}
  0x6b   : > { %596 = dma.hbm_to_vmem [thread:$0]  (!%p949_p11), %s958_s14, 256, %s993_s7, %s995_s28, %s1135_s13, %s1135_s13, %s1134_s12  }
  0x6c   : > { %p1136_p0 = scmp.ne.s32.totalorder %s1126_s23, 0 }
  0x6d   : > { %s1027_s24 = sand.u32 (!%p1136_p0), 1, %s797_s16   ;;  %p1137_p4 = scmp.ne.s32.totalorder (!%p1136_p0), %s1124_s21, 0 }
  0x6e   : > { %221 = sbr.rel (%p1136_p0) target bundleno = 374 (0x176), region = 36  ;;  %s1030_s20 = sshll.u32 (!%p1136_p0), %s1027_s24, 4 }
  0x6f   : > { %s224_s9 = scalar_lea.sflag (!%p1136_p0), [#allocation3], %s1027_s24  ;;  %s227_s11 = scalar_lea.vmem (!%p1136_p0), [#allocation2], %s1030_s20 }
  0x75   : > { %776 = dma.done.wait (%p1137_p4), %s224_s9, 256  }
  0x76   : > { %778 = vsyncadd (%p1137_p4), %s224_s9, 4294967040  ;;  %s232_s23 = sand.u32 1, %s862_s19   ;;  %s236_s12 = scalar_lea.vmem [#allocation5], %s1030_s20 }
  0x77   : > { %s233_s14 = scalar_lea.sflag [#allocation6], %s232_s23 }
  0x78   : > { %780 = dma.done.wait (%p1137_p4), %s233_s14, 256  }
  0x79   : > { %782 = vsyncadd (%p1137_p4), %s233_s14, 4294967040  ;;  %p1138_p11 = scmp.eq.s32.totalorder %s862_s19, 0 }
  0x7b   : > { %784 = dma.done.wait (%p1138_p11), [#allocation6], 1024   ;;  %p1139_p13 = pmov %p1138_p11 }
  0x7c   : > { %v275_v0 = vld [vmem:[#allocation7] sm:$0xff]  ;;  %v276_v1 = vld [vmem:[#allocation7 + $0x8] sm:$0xff]  ;;  %v277_v2 = vld [vmem:[#allocation7 + $0x10] sm:$0xff]  ;;  %vm290_vm0 = vcmask 523264   ;;  %s812_s21 = smov 64   ;;  %s269_s8 = scalar_lea.vmem [#allocation8], %s1030_s20 }
  0x7d   : > { %786 = vsyncadd (%p1139_p13), [#allocation6], 4294966272  ;;  %v560_v3 = vpack.c.bf16 %v276_v1, %v275_v0  ;;  %v278_v4 = vld [vmem:[#allocation7 + $0x18] sm:$0xff]  ;;  %v279_v6 = vld [vmem:[#allocation7 + $0x20] sm:$0xff]  ;;  %s400_s28 = sshll.u32 %s269_s8, 4  ;;  %s530_s26 = sshll.u32 %s862_s19, 8  ;;  %s1059_s28 = int_to_ptr.vmem [resolvable:$true] %s400_s28 }
  0x7e   : > { %v564_v5 = vpack.c.bf16 %v278_v4, %v277_v2  ;;  %v280_v7 = vld [vmem:[#allocation7 + $0x28] sm:$0xff]  ;;  %v273_v8 = vld [vmem:[%s236_s12] sm:$0xff]  ;;  %v282_v13 = vld [vmem:[#allocation7 + $0x38] sm:$0xff]  ;;  %s1064_s2 = scalar_lea.hbm %s1114_s4, %s530_s26  ;;  %s387_s19 = scalar_lea.sflag [#allocation4], %s1027_s24 }
  0x7f   : > { %561 = vmatprep.subr.bf16.mxu0 %v560_v3  ;;  %557 = vmatprep.mubr.msk.f32.mxu0 %vm290_vm0, %v273_v8  ;;  %v372_v9 = vld [vmem:[%s227_s11] sm:$0xff]  ;;  %v568_v10 = vpack.c.bf16 %v280_v7, %v279_v6  ;;  %v373_v11 = vld [vmem:[%s227_s11 + $0x8] sm:$0xff]  ;;  %s731_s6 = scalar_lea.vmem %s1059_s28, 256  ;;  %s813_s25 = smov [#allocation8]  }
  0x80   : > { %563 = vmatpush3.bf16.msra.mxu0 %v560_v3  ;;  %376 = vrot.lane.b32.xlu0 %v372_v9, %s812_s21  ;;  %v281_v12 = vld [vmem:[#allocation7 + $0x30] sm:$0xff]  ;;  %v274_v15 = vld [vmem:[%s236_s12 + $0x8] sm:$0xff]  ;;  %v520_v17 = vld [vmem:[%s1113_s3] ss:$0 sm:$0xff]  ;;  %p732_p3 = scmp.ne.s32.totalorder %s1059_s28, %s731_s6  ;;  %s735_s29 = sshll.u32 %s813_s25, 4  ;;  %s736_s29 = int_to_ptr.vmem [resolvable:$false] %s735_s29 }
  0x81   : > { %565 = vmatprep.subr.bf16.mxu0 %v564_v5  ;;  %v572_v14 = vpack.c.bf16 %v282_v13, %v281_v12  ;;  %s737_s0 = scalar_lea.vmem %s736_s29, 512  ;;  %p738_p1 = scmp.lt.s32.totalorder %s1059_s28, %s736_s29 }
  0x82   : > { %p733_p7 = pnand %p732_p3, %p935_p12  ;;  %p739_p5 = scmp.lt.s32.totalorder %s737_s0, %s731_s6 }
  0x84   : > { %567 = vmatpush3.bf16.msra.mxu0 %v564_v5  ;;  %378 = vrot.lane.b32.xlu0 %v373_v11, %s812_s21  ;;  %p734_p9 = pneg %p733_p7  ;;  %p740_p2 = por %p739_p5, %p738_p1 }
  0x85   : > { %569 = vmatprep.subr.bf16.mxu0 %v568_v10 }
  0x86   : > { %p741_p6 = pnand %p740_p2, %p734_p9 }
  0x88   : > { %571 = vmatpush3.bf16.msra.mxu0 %v568_v10 }
  0x89   : > { %573 = vmatprep.subr.bf16.mxu0 %v572_v14 }
  0x8c   : > { %575 = vmatpush3.bf16.msra.mxu0 %v572_v14 }
  0x8f   : > { %558 = vmatmul.mubr.msk.f32.vlgmr.msra.gmra.mrb[0].mxu0 %vm290_vm0, %v274_v15 }
  0xf2   : > { %v377_v16 = vpop.permute.xlu0 %376 }
  0xf6   : > { %v379_v19 = vpop.permute.xlu0 %378 }
 0x162   : > { %v559_v18 = vpop.f32.mrb[0].mxu0 }
 0x163   : > { %v369_v20 = vadd.f32 %v559_v18, %v520_v17  ;;  %v363_v21 = vpop.f32.mrb[1].mxu0 }
 0x164   : > { %v364_v22 = vadd.f32 %v520_v17, %v363_v21 }
 0x165   : > { %v383_v23 = vsel %vm290_vm0, %v369_v20, %v379_v19 }
 0x166   : > { %v382_v24 = vsel %vm290_vm0, %v364_v22, %v377_v16  ;;  %385 = vst [vmem:[%s269_s8 + $0x8] sm:$0xff] %v383_v23 }
 0x167   : > { %384 = vst [vmem:[%s269_s8] sm:$0xff] %v382_v24 }
 0x168   : > { %744 = shalt.err (!%p741_p6)
}
 0x169   : > { %s745_s20 = scalar_lea.hbm %s1064_s2, 256  ;;  %s749_s23 = scalar_lea.hbm %s1114_s4, 512 }
 0x16a   : > { %p746_p8 = scmp.ne.s32.totalorder %s1064_s2, %s745_s20  ;;  %p750_p4 = scmp.lt.u32.totalorder %s1064_s2, %s1114_s4 }
 0x16b   : > { %p751_p11 = scmp.lt.u32.totalorder %s749_s23, %s745_s20  ;;  %p753_p3 = scmp.lt.u32.totalorder %s745_s20, %s1064_s2 }
 0x16c   : > { %p747_p10 = pnand %p746_p8, %p935_p12 }
 0x16d   : > { %p752_p13 = por %p751_p11, %p750_p4 }
 0x16e   : > { %p748_p0 = pneg %p747_p10 }
 0x16f   : > { %p754_p7 = por %p753_p3, %p752_p13 }
 0x171   : > { %p755_p9 = pnand %p754_p7, %p748_p0 }
 0x173   : > { %758 = shalt.err (!%p755_p9)
}
 0x174   : > { %s814_s21 = smov 128   ;;  %s815_s13 = smov 8  }
 0x175   : > { %584 = dma.vmem_to_hbm [thread:$0]  (%p935_p12), %s1059_s28, 256, %s1064_s2, %s387_s19, %s814_s21, %s814_s21, %s815_s13  }
 0x176 PF: > { %s415_s7 = sand.u32 1, %s793_s15   ;;  %p1140_p1 = scmp.ne.s32.totalorder %s1125_s22, 0 }
 0x177   : > { %p1141_p5 = scmp.ge.s32.totalorder %s805_s18, 2  ;;  %s416_s8 = scalar_lea.sflag [#allocation4], %s415_s7 }
 0x179   : > { %p598_p2 = pnand %p1141_p5, %p1140_p1 }
 0x17b   : > { %788 = dma.done.wait (!%p598_p2), %s416_s8, 256  }
 0x17c   : > { %790 = vsyncadd (!%p598_p2), %s416_s8, 4294967040  ;;  %s1142_s26 = sld [smem:[#allocation13_spill]]  ;;  %p20_p6 = scmp.ge.s32.totalorder %s897_s27, 4  }
 0x17d   : > { %s1143_s15 = smov %s797_s16  ;;  %s1144_s16 = smov %s801_s17 }
 0x17e   : > { %s1146_s18 = smov %s897_s27  ;;  %22 = sbr.rel (!%p20_p6) target bundleno = 10 (0xa), region = 98 }
 0x182   : > { %s1145_s17 = smov %s1142_s26 }
 0x185   :  { %421 = vsyncpa [#allocation3], 1 }
 0x186   :  { %423 = vsyncpa [#allocation3 + $0x1], 1 }
 0x187   :  { %424 = vsyncpa [#allocation6], 1 }
 0x188   :  { %426 = vsyncpa [#allocation6 + $0x1], 1 }
 0x189   :  { %427 = vsyncpa [#allocation4], 1 }
 0x18a   :  { %429 = vsyncpa [#allocation4 + $0x1], 1 }

</bundles_post_ra>
